<compile_context>
chip_gen: v6e
topology: v6e:2x2x1
jax: 0.10.0
libtpu: 0.0.40
codegen_flags: <defaults>
</compile_context>

<pallas_src>
import jax
import jax.numpy as jnp
from jax.experimental import pallas as pl
from jax.experimental.pallas import tpu as pltpu


def _round_up(x: int, m: int) -> int:
    return ((x + m - 1) // m) * m


def _scaling_id_kernel(ids_ref, w_ref, o_ref):
    # Grid: (batch_tiles, table_tiles); table axis is the reduction ("arbitrary").
    j = pl.program_id(1)
    tm = ids_ref.shape[0]
    tn = w_ref.shape[1]

    @pl.when(j == 0)
    def _():
        o_ref[...] = jnp.zeros_like(o_ref)

    ids = ids_ref[...]                                            # (tm, 1) int32
    col = jax.lax.broadcasted_iota(jnp.int32, (tm, tn), 1) + j * tn
    w_row = jnp.broadcast_to(w_ref[...], (tm, tn))                # (tm, tn) f32
    picked = jnp.where(col == ids, w_row, 0.0)                    # one-hot select
    o_ref[...] += jnp.sum(picked, axis=1, keepdims=True)          # (tm, 1)

    @pl.when(j == pl.num_programs(1) - 1)
    def _():
        o_ref[...] = jnp.exp(o_ref[...])


def scaling_id_forward(x: jax.Array, emb_weight: jax.Array) -> jax.Array:
    """Forward pass of Scaling_ID: exp(embedding_lookup(x)).

    x:          integer participant ids, any shape.
    emb_weight: (num_participants, 1) float embedding table
                (same convention as torch nn.Embedding.weight).
    """
    orig_shape = x.shape
    ids_flat = x.reshape(-1).astype(jnp.int32)
    B = int(ids_flat.shape[0])
    N = int(emb_weight.shape[0])

    # Tile sizes: batch tile is 8-aligned (<= 512), table tile is 128-aligned
    # (<= 2048).  Pad both dims so tiles divide exactly — no unaligned fallback.
    tm = min(512, _round_up(max(B, 1), 8))
    Bp = _round_up(max(B, 1), tm)
    tn = min(2048, _round_up(max(N, 1), 128))
    Np = _round_up(max(N, 1), tn)

    # Padded ids (pad with 0: a valid row, padded outputs are sliced away).
    ids_p = jnp.zeros((Bp, 1), dtype=jnp.int32).at[:B, 0].set(ids_flat)

    # Lane-dense table row (1, Np); a (N,1)->(1,N) reshape is free (no HBM
    # transpose copy), padding rows are zero and can never be selected.
    w_row = jnp.zeros((1, Np), dtype=jnp.float32).at[0, :N].set(
        emb_weight.reshape(-1).astype(jnp.float32)
    )

    grid = (Bp // tm, Np // tn)

    cost = pl.CostEstimate(
        flops=3 * Bp * Np,            # compare + select + reduce-add
        transcendentals=Bp,           # exp
        bytes_accessed=4 * (Bp + Np + Bp),
    )

    out = pl.pallas_call(
        _scaling_id_kernel,
        out_shape=jax.ShapeDtypeStruct((Bp, 1), jnp.float32),
        grid_spec=pltpu.PrefetchScalarGridSpec(
            num_scalar_prefetch=0,
            grid=grid,
            in_specs=[
                pl.BlockSpec((tm, 1), lambda i, j: (i, 0)),   # ids tile
                pl.BlockSpec((1, tn), lambda i, j: (0, j)),   # table row tile
            ],
            out_specs=pl.BlockSpec((tm, 1), lambda i, j: (i, 0)),
        ),
        compiler_params=pltpu.CompilerParams(
            dimension_semantics=("parallel", "arbitrary"),
        ),
        cost_estimate=cost,
    )(ids_p, w_row)

    return out[:B].reshape(orig_shape + (1,))


def init_scaling_id_weight(key, num_participants: int) -> jax.Array:
    """Matches torch init: normal(mean=-2.3, std=0.5), shape (num_participants, 1)."""
    mn, std = -2.3, 0.5
    return mn + std * jax.random.normal(key, (num_participants, 1), dtype=jnp.float32)


def hierarchical_loss(ids: jax.Array):
    """Matches the torch module: temps are fitted freely, loss contribution is 0."""
    return 0


if __name__ == "__main__":
    key = jax.random.PRNGKey(0)
    k_w, k_ids = jax.random.split(key)

    num_participants = 16
    batch = 8

    weight = init_scaling_id_weight(k_w, num_participants)          # (16, 1)
    ids = jax.random.randint(k_ids, (batch,), 0, num_participants, dtype=jnp.int32)

    out = scaling_id_forward(ids, weight)
    out = jax.block_until_ready(out)

    # Reference: exp(embedding lookup), shape (batch, 1).
    ref = jnp.exp(weight[ids])
    assert out.shape == (batch, 1), out.shape
    assert jnp.allclose(out, ref, atol=1e-5, rtol=1e-5), "mismatch vs reference"

    print("KERNEL_OK")
</pallas_src>

<mosaic_0001>
module attributes {stable_mosaic.version = 11 : i64} {
  func.func @_scaling_id_kernel(%arg0: i32, %arg1: i32, %arg2: memref<8x1xi32, #tpu.memory_space<vmem>>, %arg3: memref<1x128xf32, #tpu.memory_space<vmem>>, %arg4: memref<8x1xf32, #tpu.memory_space<vmem>>) attributes {dimension_semantics = [#tpu.dimension_semantics<parallel>, #tpu.dimension_semantics<arbitrary>], iteration_bounds = array<i64: 1, 1>, scalar_prefetch = 0 : i64, scratch_operands = 0 : i64, tpu.core_type = #tpu.core_type<tc>, window_params = [{transform_indices = @transform_0, window_bounds = array<i64: 8, 1>}, {transform_indices = @transform_1, window_bounds = array<i64: 1, 128>}, {transform_indices = @transform_2, window_bounds = array<i64: 8, 1>}]} {
    %c0_i32 = arith.constant 0 : i32
    %0 = arith.cmpi eq, %arg1, %c0_i32 : i32
    %1 = arith.extui %0 : i1 to i32
    %c0_i32_0 = arith.constant 0 : i32
    %2 = arith.cmpi ne, %1, %c0_i32_0 : i32
    scf.if %2 {
      %cst_11 = arith.constant 0.000000e+00 : f32
      %23 = vector.broadcast %cst_11 : f32 to vector<8x1xf32>
      %c0_12 = arith.constant 0 : index
      %c0_13 = arith.constant 0 : index
      %24 = vector.load %arg4[%c0_12, %c0_13] : memref<8x1xf32, #tpu.memory_space<vmem>>, vector<8x1xf32>
      tpu.vector_store %arg4[%c0_12, %c0_13], %23 {strides = array<i32>} : memref<8x1xf32, #tpu.memory_space<vmem>>, vector<8x1xf32>,
    } else {
    }
    %c0 = arith.constant 0 : index
    %c0_1 = arith.constant 0 : index
    %3 = vector.load %arg2[%c0, %c0_1] : memref<8x1xi32, #tpu.memory_space<vmem>>, vector<8x1xi32>
    %4 = tpu.iota {dimensions = array<i32: 1>} : vector<8x128xi32>
    %c128_i32 = arith.constant 128 : i32
    %5 = arith.muli %arg1, %c128_i32 : i32
    %6 = vector.broadcast %5 : i32 to vector<8x128xi32>
    %7 = arith.addi %4, %6 : vector<8x128xi32>
    %c0_2 = arith.constant 0 : index
    %c0_3 = arith.constant 0 : index
    %8 = vector.load %arg3[%c0_2, %c0_3] : memref<1x128xf32, #tpu.memory_space<vmem>>, vector<1x128xf32>
    %9 = vector.shape_cast %8 : vector<1x128xf32> to vector<1x128xf32>
    %10 = vector.broadcast %9 : vector<1x128xf32> to vector<8x128xf32>
    %11 = vector.broadcast %3 : vector<8x1xi32> to vector<8x128xi32>
    %12 = arith.cmpi eq, %7, %11 : vector<8x128xi32>
    %cst = arith.constant 0.000000e+00 : f32
    %13 = vector.broadcast %cst : f32 to vector<8x128xf32>
    %14 = arith.select %12, %10, %13 : vector<8x128xi1>, vector<8x128xf32>
    %c0_4 = arith.constant 0 : index
    %c0_5 = arith.constant 0 : index
    %15 = vector.load %arg4[%c0_4, %c0_5] : memref<8x1xf32, #tpu.memory_space<vmem>>, vector<8x1xf32>
    %cst_6 = arith.constant dense<0.000000e+00> : vector<8xf32>
    %16 = vector.multi_reduction <add>, %14, %cst_6 [1] : vector<8x128xf32> to vector<8xf32>
    %17 = vector.shape_cast %16 : vector<8xf32> to vector<8x1xf32>
    %18 = arith.addf %15, %17 : vector<8x1xf32>
    %c0_7 = arith.constant 0 : index
    %c0_8 = arith.constant 0 : index
    %19 = vector.load %arg4[%c0_7, %c0_8] : memref<8x1xf32, #tpu.memory_space<vmem>>, vector<8x1xf32>
    tpu.vector_store %arg4[%c0_7, %c0_8], %18 {strides = array<i32>} : memref<8x1xf32, #tpu.memory_space<vmem>>, vector<8x1xf32>,
    %c0_i32_9 = arith.constant 0 : i32
    %20 = arith.cmpi eq, %arg1, %c0_i32_9 : i32
    %21 = arith.extui %20 : i1 to i32
    %c0_i32_10 = arith.constant 0 : i32
    %22 = arith.cmpi ne, %21, %c0_i32_10 : i32
    scf.if %22 {
      %c0_11 = arith.constant 0 : index
      %c0_12 = arith.constant 0 : index
      %23 = vector.load %arg4[%c0_11, %c0_12] : memref<8x1xf32, #tpu.memory_space<vmem>>, vector<8x1xf32>
      %24 = math.exp %23 : vector<8x1xf32>
      %c0_13 = arith.constant 0 : index
      %c0_14 = arith.constant 0 : index
      %25 = vector.load %arg4[%c0_13, %c0_14] : memref<8x1xf32, #tpu.memory_space<vmem>>, vector<8x1xf32>
      tpu.vector_store %arg4[%c0_13, %c0_14], %24 {strides = array<i32>} : memref<8x1xf32, #tpu.memory_space<vmem>>, vector<8x1xf32>,
    } else {
    }
    return
  }
  func.func @transform_0(%arg0: i32, %arg1: i32) -> (i32, i32) {
    %c0_i32 = arith.constant 0 : i32
    %c0_i32_0 = arith.constant 0 : i32
    return %arg0, %c0_i32 : i32, i32
  }
  func.func @transform_1(%arg0: i32, %arg1: i32) -> (i32, i32) {
    %c0_i32 = arith.constant 0 : i32
    %c0_i32_0 = arith.constant 0 : i32
    return %c0_i32, %arg1 : i32, i32
  }
  func.func @transform_2(%arg0: i32, %arg1: i32) -> (i32, i32) {
    %c0_i32 = arith.constant 0 : i32
    %c0_i32_0 = arith.constant 0 : i32
    return %arg0, %c0_i32 : i32, i32
  }
}

</mosaic_0001>

<bundles_post_ra>
// kernel: tpu_custom_call.1
= control target key start
LH: loop header
LB: loop body
LE: loop exit
PB: predicated region body
PF: predicated region fallthrough
CT: control target
= control target key end

     0   :  { %vm15_vm0 = vcmask 7168   ;;  %v58_v0 = vmov 0   ;;  %v59_v2 = vmov 0.0   ;;  %v18_v3 = vlaneseq  ;;  %s99_s0 = inlined_call_operand.vmem [shape: s32[8,1], index: 0, kind: input, shape index: {}]   ;;  %s100_s2 = inlined_call_operand.vmem [shape: f32[8,1], index: 2, kind: output, shape index: {}]   ;;  %s101_s1 = inlined_call_operand.vmem [shape: f32[1,128], index: 1, kind: input, shape index: {}]  }
   0x1   :  { %55 = vset.pattern.permute.xlu0 %v58_v0  ;;  %v17_v1 = vld [vmem:[%s99_s0] sm:$0xff]  ;;  %16 = vst.msk [vmem:[%s100_s2] sm:$0xff] %vm15_vm0, %v59_v2 }
   0x2   :  { %31 = vperm.xlu0 %55, %v17_v1   ;;  %v19_v4 = vand.u32 127, %v18_v3  ;;  %v52_v5 = vld [vmem:[%s101_s1] ss:$0 sm:$0xff] }
   0x8   :  { %v35_v8 = vld [vmem:[%s100_s2] sm:$0xff] }
  0x7d   :  { %v32_v6 = vpop.permute.xlu0 %31 }
  0x7e   :  { %vm33_vm1 = vcmp.eq.s32.totalorder %v19_v4, %v32_v6 }
  0x7f   :  { %v34_v7 = vsel %vm33_vm1, %v52_v5, 0.0 }
  0x80   :  { %36 = vadd.xlane.f32.xlu0 %v34_v7 }
 0x109   :  { %v37_v9 = vpop.xlane.xlu0 %36 }
 0x10a   :  { %v38_v10 = vadd.f32 %v37_v9, %v35_v8 }
 0x10c   :  { %40 = vst.msk [vmem:[%s100_s2] sm:$0xff] %vm15_vm0, %v38_v10 }
 0x113   :  { %v44_v11 = vld [vmem:[%s100_s2] sm:$0xff] }
 0x114   :  { %v45_v12 = vmul.f32 1.442695, %v44_v11 }
 0x116   :  { %56 = vpow2.f32 %v45_v12 }
 0x123   :  { %v57_v13 = vpop.eup %56 }
 0x124   :  { %47 = vst.msk [vmem:[%s100_s2] sm:$0xff] %vm15_vm0, %v57_v13 }

</bundles_post_ra>
